<compile_context>
chip_gen: v6e
topology: v6e:2x2x1
jax: 0.10.0
libtpu: 0.0.40
codegen_flags: <defaults>
</compile_context>

<pallas_src>
import functools

import jax
import jax.numpy as jnp
from jax.experimental import pallas as pl
from jax.experimental.pallas import tpu as pltpu


# ---------------------------------------------------------------------------
# In-kernel math
# ---------------------------------------------------------------------------
def _ln_rows(x, w, b, eps):
    """torch.std_mean(unbiased=True)-style LayerNorm on a (TB, D) f32 tile.

    x: (TB, D) f32, w/b: (1, D) f32 (broadcast over rows).
    """
    d = x.shape[-1]
    mean = jnp.mean(x, axis=-1, keepdims=True)
    xc = x - mean  # reused for variance reduction AND normalization
    # unbiased variance: divide by (N - 1), matching torch.std_mean(..., True)
    var = jnp.sum(xc * xc, axis=-1, keepdims=True) * (1.0 / (d - 1))
    std = jnp.sqrt(var)
    # Per-row reciprocal (TB values) + broadcast multiply instead of TB*D divides.
    inv = 1.0 / (std + eps)
    return w * (xc * inv) + b


def _layernorm_kernel(x_ref, w_ref, b_ref, o_ref, *, eps):
    x = x_ref[...].astype(jnp.float32)
    w = w_ref[...].astype(jnp.float32)
    b = b_ref[...].astype(jnp.float32)
    o_ref[...] = _ln_rows(x, w, b, jnp.float32(eps)).astype(o_ref.dtype)


def _block_tail_kernel(x_ref, sc_ref, w1_ref, b1_ref, w2_ref, b2_ref, o_ref, *, eps):
    # Fused Block tail: y = LN2( LN1(x + shortcut) + shortcut )
    x = x_ref[...].astype(jnp.float32)
    sc = sc_ref[...].astype(jnp.float32)
    e = jnp.float32(eps)
    y = _ln_rows(x + sc,
                 w1_ref[...].astype(jnp.float32),
                 b1_ref[...].astype(jnp.float32), e)
    y = _ln_rows(y + sc,
                 w2_ref[...].astype(jnp.float32),
                 b2_ref[...].astype(jnp.float32), e)
    o_ref[...] = y.astype(o_ref.dtype)


# ---------------------------------------------------------------------------
# Tiling helpers / wrappers
# ---------------------------------------------------------------------------
def _ceil_div(a, b):
    return -(-a // b)


def _sublane(dtype):
    # 8 rows for 32-bit, 16 for bf16/f16, 32 for int8/fp8 (sublane packing).
    itemsize = jnp.dtype(dtype).itemsize
    return max(8, 32 // itemsize)


def _vmem_capacity_bytes():
    try:
        info = pltpu.get_tpu_info()
        cap = getattr(info, "vmem_capacity_bytes", None)
        if cap:
            return int(cap)
    except Exception:
        pass
    return 64 * 1024 * 1024  # conservative fallback (v7x per-TC VMEM)


def _tile_plan(batch, d, dtype, *, n_row_streams, n_f32_slabs):
    """Pick (block_rows, grid, vmem_limit_bytes) for a row-streaming LN kernel.

    n_row_streams: row-shaped HBM streams (inputs + output), double-buffered.
    n_f32_slabs:   rough count of (TB, D) f32 intermediates inside the kernel.
    """
    itemsize = jnp.dtype(dtype).itemsize
    sub = _sublane(dtype)
    cap = _vmem_capacity_bytes()
    # Explicit scoped-VMEM limit: well above the 16/32 MiB defaults, below physical.
    vmem_limit = int(min(cap - (8 << 20), int(cap * 0.75)))
    vmem_limit = max(vmem_limit, 16 << 20)

    # VMEM bytes needed per block row.
    bytes_per_row = n_row_streams * 2 * itemsize * d + n_f32_slabs * 4 * d
    budget = int(vmem_limit * 0.6)
    tb = budget // max(bytes_per_row, 1)
    if tb < sub:
        # TODO(synk): column-tiled (two-pass over D, "arbitrary" grid axis) fallback.
        raise ValueError(
            f"feature dim D={d} too large for a ({sub}, D) row tile within "
            f"~{vmem_limit >> 20} MiB of VMEM; needs a column-tiled kernel.")
    tb = (tb // sub) * sub
    tb = min(tb, 2048)

    if batch <= sub:
        # Single full-extent block: both dims equal the array dims (valid even
        # when batch is not a sublane multiple); no padding, no masking.
        return batch, (1,), vmem_limit

    # Force >= 2 grid steps so ("parallel",) shards across both v7x TensorCores.
    half_rows = _ceil_div(_ceil_div(batch, 2), sub) * sub  # in [sub, batch)
    tb = max(sub, min(tb, half_rows))
    grid = (pl.cdiv(batch, tb),)
    return tb, grid, vmem_limit


def layer_norm(x, weight, bias, eps=1e-5, *, block_rows=None):
    """x: (B, C, H, W); weight/bias: (C, H, W). Normalizes over (C, H, W)."""
    B, C, H, W = x.shape
    D = C * H * W
    x2 = x.reshape(B, D)
    w2 = weight.reshape(1, D)
    b2 = bias.reshape(1, D)

    tb, grid, vmem_limit = _tile_plan(B, D, x.dtype, n_row_streams=2, n_f32_slabs=3)
    if block_rows is not None:
        sub = _sublane(x.dtype)
        tb = max(sub, (block_rows // sub) * sub)
        if tb >= B:
            tb = B
        grid = (pl.cdiv(B, tb),)

    out = pl.pallas_call(
        functools.partial(_layernorm_kernel, eps=eps),
        out_shape=jax.ShapeDtypeStruct((B, D), x.dtype),
        grid=grid,
        in_specs=[
            pl.BlockSpec((tb, D), lambda i: (i, 0)),
            pl.BlockSpec((1, D), lambda i: (0, 0)),   # constant -> not re-DMA'd
            pl.BlockSpec((1, D), lambda i: (0, 0)),
        ],
        out_specs=pl.BlockSpec((tb, D), lambda i: (i, 0)),
        compiler_params=pltpu.CompilerParams(
            dimension_semantics=("parallel",),
            vmem_limit_bytes=vmem_limit),
    )(x2, w2, b2)
    return out.reshape(B, C, H, W)


def block_layernorm_tail(x, shortcut, w1, b1, w2, b2, eps=1e-6, *, block_rows=None):
    """Fused Block tail: LN2(LN1(x + shortcut) + shortcut). Shapes as layer_norm."""
    B, C, H, W = x.shape
    D = C * H * W
    x2 = x.reshape(B, D)
    s2 = shortcut.reshape(B, D)
    w1r, b1r = w1.reshape(1, D), b1.reshape(1, D)
    w2r, b2r = w2.reshape(1, D), b2.reshape(1, D)

    tb, grid, vmem_limit = _tile_plan(B, D, x.dtype, n_row_streams=3, n_f32_slabs=5)
    if block_rows is not None:
        sub = _sublane(x.dtype)
        tb = max(sub, (block_rows // sub) * sub)
        if tb >= B:
            tb = B
        grid = (pl.cdiv(B, tb),)

    row_spec = pl.BlockSpec((tb, D), lambda i: (i, 0))
    vec_spec = pl.BlockSpec((1, D), lambda i: (0, 0))

    out = pl.pallas_call(
        functools.partial(_block_tail_kernel, eps=eps),
        out_shape=jax.ShapeDtypeStruct((B, D), x.dtype),
        grid=grid,
        in_specs=[row_spec, row_spec, vec_spec, vec_spec, vec_spec, vec_spec],
        out_specs=pl.BlockSpec((tb, D), lambda i: (i, 0)),
        compiler_params=pltpu.CompilerParams(
            dimension_semantics=("parallel",),
            vmem_limit_bytes=vmem_limit),
    )(x2, s2, w1r, b1r, w2r, b2r)
    return out.reshape(B, C, H, W)


# ---------------------------------------------------------------------------
# Pure-JAX references (torch.std_mean unbiased semantics)
# ---------------------------------------------------------------------------
def layer_norm_ref(x, weight, bias, eps):
    dims = (1, 2, 3)
    mean = jnp.mean(x, axis=dims, keepdims=True)
    std = jnp.std(x, axis=dims, keepdims=True, ddof=1)
    y = (x - mean) / (std + eps)
    return weight[None] * y + bias[None]


def block_tail_ref(x, shortcut, w1, b1, w2, b2, eps):
    y = layer_norm_ref(x + shortcut, w1, b1, eps)
    y = layer_norm_ref(y + shortcut, w2, b2, eps)
    return y


if __name__ == "__main__":
    key = jax.random.PRNGKey(0)
    kx, ks, k1w, k1b, k2w, k2b = jax.random.split(key, 6)

    B, C, H, W = 2, 4, 16, 16
    x = jax.random.normal(kx, (B, C, H, W), dtype=jnp.float32)
    shortcut = jax.random.normal(ks, (B, C, H, W), dtype=jnp.float32)

    # Module __init__ uses ones / zeros; perturb deterministically so the
    # affine path is actually exercised.
    w1 = jnp.ones((C, H, W), jnp.float32) + 0.1 * jax.random.normal(k1w, (C, H, W), jnp.float32)
    b1 = 0.1 * jax.random.normal(k1b, (C, H, W), jnp.float32)
    w2 = jnp.ones((C, H, W), jnp.float32) + 0.1 * jax.random.normal(k2w, (C, H, W), jnp.float32)
    b2 = 0.1 * jax.random.normal(k2b, (C, H, W), jnp.float32)

    eps = 1e-6  # Block constructs LayerNorm(renorm_shape, eps=1e-06, ...)

    # 1) standalone LayerNorm kernel (small batch -> single full-extent block)
    out = jax.block_until_ready(layer_norm(x, w1, b1, eps=eps))
    ref = layer_norm_ref(x, w1, b1, eps)
    assert out.shape == (B, C, H, W)
    assert jnp.allclose(out, ref, atol=1e-5, rtol=1e-5), float(jnp.max(jnp.abs(out - ref)))

    # 2) fused residual-add + LN1 + add + LN2 (the Block.forward tail)
    out2 = jax.block_until_ready(block_layernorm_tail(x, shortcut, w1, b1, w2, b2, eps=eps))
    ref2 = block_tail_ref(x, shortcut, w1, b1, w2, b2, eps)
    assert jnp.allclose(out2, ref2, atol=2e-5, rtol=1e-5), float(jnp.max(jnp.abs(out2 - ref2)))

    # 3) batch that is not a tile multiple: exercises the multi-step grid with
    #    a partial last block (no HBM pad, no output slice).
    B2 = 20
    xb = jax.random.normal(jax.random.PRNGKey(1), (B2, C, H, W), dtype=jnp.float32)
    sb = jax.random.normal(jax.random.PRNGKey(2), (B2, C, H, W), dtype=jnp.float32)

    out3 = jax.block_until_ready(layer_norm(xb, w1, b1, eps=eps, block_rows=8))
    ref3 = layer_norm_ref(xb, w1, b1, eps)
    assert jnp.allclose(out3, ref3, atol=1e-5, rtol=1e-5), float(jnp.max(jnp.abs(out3 - ref3)))

    out4 = jax.block_until_ready(layer_norm(xb, w1, b1, eps=eps))  # auto plan (>=2 steps)
    assert jnp.allclose(out4, ref3, atol=1e-5, rtol=1e-5), float(jnp.max(jnp.abs(out4 - ref3)))

    out5 = jax.block_until_ready(block_layernorm_tail(xb, sb, w1, b1, w2, b2, eps=eps))
    ref5 = block_tail_ref(xb, sb, w1, b1, w2, b2, eps)
    assert jnp.allclose(out5, ref5, atol=2e-5, rtol=1e-5), float(jnp.max(jnp.abs(out5 - ref5)))

    print("KERNEL_OK")
</pallas_src>

<mosaic_0001>
module attributes {stable_mosaic.version = 11 : i64} {
  func.func @_layernorm_kernel(%arg0: i32, %arg1: memref<2x1024xf32, #tpu.memory_space<vmem>>, %arg2: memref<1x1024xf32, #tpu.memory_space<vmem>>, %arg3: memref<1x1024xf32, #tpu.memory_space<vmem>>, %arg4: memref<2x1024xf32, #tpu.memory_space<vmem>>) attributes {dimension_semantics = [#tpu.dimension_semantics<parallel>], iteration_bounds = array<i64: 1>, scalar_prefetch = 0 : i64, scratch_operands = 0 : i64, tpu.core_type = #tpu.core_type<tc>, window_params = [{transform_indices = @transform_0, window_bounds = array<i64: 2, 1024>}, {pipeline_mode = #tpu.pipeline_mode<synchronous>, transform_indices = @transform_1, window_bounds = array<i64: 1, 1024>}, {pipeline_mode = #tpu.pipeline_mode<synchronous>, transform_indices = @transform_2, window_bounds = array<i64: 1, 1024>}, {transform_indices = @transform_3, window_bounds = array<i64: 2, 1024>}]} {
    %c0 = arith.constant 0 : index
    %c0_0 = arith.constant 0 : index
    %0 = vector.load %arg1[%c0, %c0_0] : memref<2x1024xf32, #tpu.memory_space<vmem>>, vector<2x1024xf32>
    %c0_1 = arith.constant 0 : index
    %c0_2 = arith.constant 0 : index
    %1 = vector.load %arg2[%c0_1, %c0_2] : memref<1x1024xf32, #tpu.memory_space<vmem>>, vector<1x1024xf32>
    %c0_3 = arith.constant 0 : index
    %c0_4 = arith.constant 0 : index
    %2 = vector.load %arg3[%c0_3, %c0_4] : memref<1x1024xf32, #tpu.memory_space<vmem>>, vector<1x1024xf32>
    %cst = arith.constant dense<0.000000e+00> : vector<2xf32>
    %3 = vector.multi_reduction <add>, %0, %cst [1] : vector<2x1024xf32> to vector<2xf32>
    %4 = vector.shape_cast %3 : vector<2xf32> to vector<2x1xf32>
    %cst_5 = arith.constant 1.024000e+03 : f32
    %5 = vector.broadcast %cst_5 : f32 to vector<2x1xf32>
    %6 = arith.divf %4, %5 : vector<2x1xf32>
    %7 = vector.broadcast %6 : vector<2x1xf32> to vector<2x1024xf32>
    %8 = arith.subf %0, %7 : vector<2x1024xf32>
    %9 = arith.mulf %8, %8 : vector<2x1024xf32>
    %cst_6 = arith.constant dense<0.000000e+00> : vector<2xf32>
    %10 = vector.multi_reduction <add>, %9, %cst_6 [1] : vector<2x1024xf32> to vector<2xf32>
    %11 = vector.shape_cast %10 : vector<2xf32> to vector<2x1xf32>
    %cst_7 = arith.constant 9.77517105E-4 : f32
    %12 = vector.broadcast %cst_7 : f32 to vector<2x1xf32>
    %13 = arith.mulf %11, %12 : vector<2x1xf32>
    %14 = math.sqrt %13 : vector<2x1xf32>
    %cst_8 = arith.constant 9.99999997E-7 : f32
    %15 = vector.broadcast %cst_8 : f32 to vector<2x1xf32>
    %16 = arith.addf %14, %15 : vector<2x1xf32>
    %cst_9 = arith.constant 1.000000e+00 : f32
    %17 = vector.broadcast %cst_9 : f32 to vector<2x1xf32>
    %18 = arith.divf %17, %16 : vector<2x1xf32>
    %19 = vector.broadcast %18 : vector<2x1xf32> to vector<2x1024xf32>
    %20 = arith.mulf %8, %19 : vector<2x1024xf32>
    %21 = vector.broadcast %1 : vector<1x1024xf32> to vector<2x1024xf32>
    %22 = arith.mulf %21, %20 : vector<2x1024xf32>
    %23 = vector.broadcast %2 : vector<1x1024xf32> to vector<2x1024xf32>
    %24 = arith.addf %22, %23 : vector<2x1024xf32>
    %c0_10 = arith.constant 0 : index
    %c0_11 = arith.constant 0 : index
    %25 = vector.load %arg4[%c0_10, %c0_11] : memref<2x1024xf32, #tpu.memory_space<vmem>>, vector<2x1024xf32>
    tpu.vector_store %arg4[%c0_10, %c0_11], %24 {strides = array<i32>} : memref<2x1024xf32, #tpu.memory_space<vmem>>, vector<2x1024xf32>,
    return
  }
  func.func @transform_0(%arg0: i32) -> (i32, i32) {
    %c0_i32 = arith.constant 0 : i32
    %c0_i32_0 = arith.constant 0 : i32
    return %arg0, %c0_i32 : i32, i32
  }
  func.func @transform_1(%arg0: i32) -> (i32, i32) {
    %c0_i32 = arith.constant 0 : i32
    %c0_i32_0 = arith.constant 0 : i32
    %c0_i32_1 = arith.constant 0 : i32
    return %c0_i32, %c0_i32_0 : i32, i32
  }
  func.func @transform_2(%arg0: i32) -> (i32, i32) {
    %c0_i32 = arith.constant 0 : i32
    %c0_i32_0 = arith.constant 0 : i32
    %c0_i32_1 = arith.constant 0 : i32
    return %c0_i32, %c0_i32_0 : i32, i32
  }
  func.func @transform_3(%arg0: i32) -> (i32, i32) {
    %c0_i32 = arith.constant 0 : i32
    %c0_i32_0 = arith.constant 0 : i32
    return %arg0, %c0_i32 : i32, i32
  }
}

</mosaic_0001>

<bundles_post_ra>
// kernel: tpu_custom_call.1
= control target key start
LH: loop header
LB: loop body
LE: loop exit
PB: predicated region body
PF: predicated region fallthrough
CT: control target
= control target key end

     0   :  { %8 = vsyncpa [#allocation3], 0  ;;  %s600_s0 = inlined_call_operand.hbm [shape: f32[2,1024], index: 0, kind: input, shape index: {}]   ;;  %s601_s1 = inlined_call_operand.hbm [shape: f32[1,1024], index: 1, kind: input, shape index: {}]   ;;  %s602_s2 = inlined_call_operand.hbm [shape: f32[1,1024], index: 2, kind: input, shape index: {}]   ;;  %s603_s3 = inlined_call_operand.hbm [shape: f32[2,1024], index: 3, kind: output, shape index: {}]  }
   0x1   :  { %9 = vsyncpa [#allocation6], 0 }
   0x2   :  { %10 = vsyncpa [#allocation4], 0  ;;  %s516_s12 = smov [#allocation5]   ;;  %s517_s14 = smov [#allocation2]  }
   0x3   :  { %s27_s13 = sshll.u32 %s516_s12, 4  ;;  %s17_s15 = sshll.u32 %s517_s14, 4  ;;  %s28_s13 = int_to_ptr.vmem [resolvable:$true] %s27_s13  ;;  %s18_s15 = int_to_ptr.vmem [resolvable:$true] %s17_s15 }
   0x4   :  { %s438_s16 = scalar_lea.vmem %s28_s13, 128  ;;  %p443_p1 = scmp.lt.s32.totalorder %s28_s13, %s28_s13 }
   0x5   :  { %p439_p0 = scmp.ne.s32.totalorder %s28_s13, %s438_s16  ;;  %p444_p2 = scmp.lt.s32.totalorder %s438_s16, %s438_s16 }
   0x7   :  { %p445_p3 = por %p444_p2, %p443_p1 }
   0x9   :  { %p446_p4 = pnand %p445_p3, %p439_p0 }
   0xb   :  { %449 = shalt.err (!%p446_p4)
}
   0xc   :  { %30 = dma.hbm_to_vmem [thread:$0]  %s601_s1, 128, %s28_s13, [#allocation6]  }
   0xd   :  { %s458_s19 = scalar_lea.vmem %s18_s15, 256  ;;  %p463_p6 = scmp.lt.s32.totalorder %s18_s15, %s18_s15 }
   0xe   :  { %p459_p5 = scmp.ne.s32.totalorder %s18_s15, %s458_s19  ;;  %p464_p7 = scmp.lt.s32.totalorder %s458_s19, %s458_s19 }
  0x10   :  { %p465_p8 = por %p464_p7, %p463_p6 }
  0x12   :  { %p466_p9 = pnand %p465_p8, %p459_p5 }
  0x14   :  { %469 = shalt.err (!%p466_p9)
}
  0x15   :  { %20 = dma.hbm_to_vmem [thread:$0]  %s600_s0, 256, %s18_s15, [#allocation3]  }
  0x16   :  { %s518_s22 = smov [#allocation7]  }
  0x17   :  { %s37_s23 = sshll.u32 %s518_s22, 4  ;;  %s38_s23 = int_to_ptr.vmem [resolvable:$true] %s37_s23 }
  0x18   :  { %s478_s24 = scalar_lea.vmem %s38_s23, 128  ;;  %p483_p11 = scmp.lt.s32.totalorder %s38_s23, %s38_s23 }
  0x19   :  { %p479_p10 = scmp.ne.s32.totalorder %s38_s23, %s478_s24  ;;  %p484_p12 = scmp.lt.s32.totalorder %s478_s24, %s478_s24 }
  0x1b   :  { %p485_p13 = por %p484_p12, %p483_p11 }
  0x1d   :  { %p486_p0 = pnand %p485_p13, %p479_p10 }
  0x1f   :  { %489 = shalt.err (!%p486_p0)
}
  0x20   :  { %40 = dma.hbm_to_vmem [thread:$0]  %s602_s2, 128, %s38_s23, [#allocation6]  }
  0x21   :  { %510 = dma.done.wait [#allocation3], 256  }
  0x22   :  { %511 = vsyncadd [#allocation3], 4294967040 }
  0x23   :  { %512 = dma.done.wait [#allocation6], 256  }
  0x24   :  { %513 = vsyncadd [#allocation6], 4294967040  ;;  %v60_v0 = vlaneseq  ;;  %v519_v1 = vmov 1983009808   ;;  %v50_v6 = vld [vmem:[#allocation2] sm:$0xff]  ;;  %v51_v7 = vld [vmem:[#allocation2 + $0x8] sm:$0xff] }
  0x25   :  { %v58_v2 = vunpack.c.l.s4 %v519_v1  ;;  %v56_v8 = vcombine.high %v50_v6, %v50_v6  ;;  %vm98_vm0 = vcmask 1041408   ;;  %v73_v12 = vcombine.high %v51_v7, %v51_v7  ;;  %s521_s0 = smov [#allocation8]  }
  0x26   :  { %v551_v3 = vshrl.u32 %v60_v0, 7  ;;  %v520_v33 = vmov 269488144   ;;  %s408_s2 = sshll.u32 %s521_s0, 4  ;;  %s409_s2 = int_to_ptr.vmem [resolvable:$true] %s408_s2 }
  0x27   :  { %v59_v4 = vunpack.c.0.s8 %v58_v2  ;;  %v120_v34 = vunpack.c.l.s4 %v520_v33  ;;  %s490_s26 = scalar_lea.vmem %s409_s2, 256  ;;  %p495_p2 = scmp.lt.s32.totalorder %s409_s2, %s409_s2 }
  0x28   :  { %p491_p1 = scmp.ne.s32.totalorder %s409_s2, %s490_s26  ;;  %p496_p3 = scmp.lt.s32.totalorder %s490_s26, %s490_s26 }
  0x29   :  { %v554_v5 = vsub.s32 %v59_v4, %v551_v3  ;;  %v121_v35 = vunpack.c.0.s8 %v120_v34 }
  0x2a   :  { %p497_p4 = por %p496_p3, %p495_p2 }
  0x2b   :  { %v63_v9 = vrot.slane %v50_v6, %v554_v5  ;;  %v70_v10 = vrot.slane %v56_v8, %v554_v5  ;;  %v80_v13 = vrot.slane %v51_v7, %v554_v5  ;;  %v87_v19 = vrot.slane %v73_v12, %v554_v5 }
  0x2c   :  { %v124_v36 = vsub.s32 %v121_v35, %v551_v3  ;;  %p498_p5 = pnand %p497_p4, %p491_p1 }
  0x2d   :  { %v71_v11 = vcombine.high %v63_v9, %v63_v9  ;;  %v99_v14 = vsel %vm98_vm0, %v63_v9, 0.0  ;;  %v72_v15 = vcombine.high %v70_v10, %v70_v10  ;;  %v102_v17 = vsel %vm98_vm0, %v70_v10, 0.0 }
  0x2e   :  { %v88_v20 = vcombine.high %v80_v13, %v80_v13  ;;  %v106_v23 = vsel %vm98_vm0, %v80_v13, 0.0  ;;  %v89_v25 = vcombine.high %v87_v19, %v87_v19  ;;  %v110_v28 = vsel %vm98_vm0, %v87_v19, 0.0  ;;  %v52_v19 = vld [vmem:[#allocation5] sm:$0xff] }
  0x2f   :  { %v100_v16 = vsel %vm98_vm0, %v71_v11, 0.0  ;;  %v104_v21 = vsel %vm98_vm0, %v72_v15, 0.0  ;;  %v217_v15 = vsub.s32 0, %v551_v3 }
  0x30   :  { %v101_v18 = vadd.f32 %v100_v16, %v99_v14  ;;  %v108_v26 = vsel %vm98_vm0, %v88_v20, 0.0  ;;  %v112_v30 = vsel %vm98_vm0, %v89_v25, 0.0  ;;  %v221_v16 = vsub.s32 1, %v551_v3  ;;  %v53_v25 = vld [vmem:[#allocation7] sm:$0xff] }
  0x31   :  { %v233_v20 = vsub.s32 4, %v551_v3 }
  0x32   :  { %v103_v22 = vadd.f32 %v102_v17, %v101_v18  ;;  %v225_v17 = vsub.s32 2, %v551_v3  ;;  %v229_v18 = vsub.s32 3, %v551_v3 }
  0x33   :  { %v234_v33 = vrot.slane %v52_v19, %v233_v20 }
  0x34   :  { %v105_v24 = vadd.f32 %v104_v21, %v103_v22  ;;  %v237_v21 = vsub.s32 5, %v551_v3 }
  0x36   :  { %v107_v27 = vadd.f32 %v106_v23, %v105_v24  ;;  %v241_v23 = vsub.s32 6, %v551_v3  ;;  %v245_v24 = vsub.s32 7, %v551_v3  ;;  %v238_v34 = vrot.slane %v52_v19, %v237_v21 }
  0x38   :  { %v109_v29 = vadd.f32 %v108_v26, %v107_v27  ;;  %v218_v27 = vrot.slane %v52_v19, %v217_v15  ;;  %v242_v35 = vrot.slane %v52_v19, %v241_v23 }
  0x3a   :  { %v111_v31 = vadd.f32 %v110_v28, %v109_v29  ;;  %v222_v28 = vrot.slane %v52_v19, %v221_v16  ;;  %v226_v29 = vrot.slane %v52_v19, %v225_v17 }
  0x3c   :  { %v113_v32 = vadd.f32 %v112_v30, %v111_v31  ;;  %v230_v30 = vrot.slane %v52_v19, %v229_v18 }
  0x3e   :  { %114 = vadd.xlane.f32.xlu0 %v113_v32 }
  0xc7   :  { %v115_v37 = vpop.xlane.xlu0 %114 }
  0xc8   :  { %v117_v38 = vmul.f32 0.0009765625, %v115_v37  ;;  %v246_v37 = vrot.slane %v52_v19, %v245_v24 }
  0xca   :  { %v125_v39 = vrot.slane %v117_v38, %v124_v36  ;;  %v311_v38 = vrot.slane %v53_v25, %v217_v15 }
  0xcc   :  { %v127_v40 = vsub.f32 %v50_v6, %v125_v39  ;;  %v128_v41 = vsub.f32 %v51_v7, %v125_v39  ;;  %v327_v39 = vrot.slane %v53_v25, %v233_v20 }
  0xce   :  { %v129_v42 = vmul.f32 %v127_v40, %v127_v40  ;;  %v130_v43 = vmul.f32 %v128_v41, %v128_v41 }
  0xd0   :  { %v133_v44 = vcombine.high %v129_v42, %v129_v42  ;;  %v140_v45 = vrot.slane %v129_v42, %v554_v5  ;;  %v157_v48 = vrot.slane %v130_v43, %v554_v5  ;;  %v150_v52 = vcombine.high %v130_v43, %v130_v43 }
  0xd2   :  { %v147_v46 = vrot.slane %v133_v44, %v554_v5  ;;  %v148_v47 = vcombine.high %v140_v45, %v140_v45  ;;  %v175_v49 = vsel %vm98_vm0, %v140_v45, 0.0  ;;  %v164_v56 = vrot.slane %v150_v52, %v554_v5 }
  0xd3   :  { %v165_v57 = vcombine.high %v157_v48, %v157_v48  ;;  %v182_v60 = vsel %vm98_vm0, %v157_v48, 0.0  ;;  %v315_v45 = vrot.slane %v53_v25, %v221_v16  ;;  %v323_v52 = vrot.slane %v53_v25, %v229_v18 }
  0xd4   :  { %v176_v50 = vsel %vm98_vm0, %v148_v47, 0.0  ;;  %v149_v51 = vcombine.high %v147_v46, %v147_v46  ;;  %v178_v54 = vsel %vm98_vm0, %v147_v46, 0.0  ;;  %v166_v62 = vcombine.high %v164_v56, %v164_v56 }
  0xd5   :  { %v177_v53 = vadd.f32 %v176_v50, %v175_v49  ;;  %v184_v63 = vsel %vm98_vm0, %v165_v57, 0.0  ;;  %v186_v1 = vsel %vm98_vm0, %v164_v56, 0.0  ;;  %v331_v46 = vrot.slane %v53_v25, %v237_v21 }
  0xd6   :  { %v180_v58 = vsel %vm98_vm0, %v149_v51, 0.0  ;;  %v188_v4 = vsel %vm98_vm0, %v166_v62, 0.0  ;;  %v335_v47 = vrot.slane %v53_v25, %v241_v23 }
  0xd7   :  { %v179_v55 = vadd.f32 %v178_v54, %v177_v53  ;;  %v339_v53 = vrot.slane %v53_v25, %v245_v24 }
  0xd9   :  { %v181_v59 = vadd.f32 %v180_v58, %v179_v55 }
  0xdb   :  { %v183_v61 = vadd.f32 %v182_v60, %v181_v59 }
  0xdd   :  { %v185_v0 = vadd.f32 %v184_v63, %v183_v61 }
  0xdf   :  { %v187_v2 = vadd.f32 %v186_v1, %v185_v0 }
  0xe1   :  { %v189_v6 = vadd.f32 %v188_v4, %v187_v2 }
  0xe3   :  { %190 = vadd.xlane.f32.xlu0 %v189_v6 }
 0x16c   :  { %v191_v7 = vpop.xlane.xlu0 %190 }
 0x16d   :  { %v192_v8 = vmul.f32 0.0009775171, %v191_v7 }
 0x16f   :  { %426 = vrsqrt.f32 %v192_v8  ;;  %vm195_vm1 = vcmp.eq.f32.partialorder %v192_v8, inf  ;;  %v198_v11 = vand.u32 2147483648, %v192_v8  ;;  %vm197_vm2 = vcmp.eq.f32.partialorder %v192_v8, 0.0 }
 0x17c   :  { %v427_v9 = vpop.eup %426 }
 0x17d   :  { %v194_v10 = vmul.f32 %v427_v9, %v192_v8 }
 0x17f   :  { %v196_v12 = vsel %vm195_vm1, %v192_v8, %v194_v10 }
 0x180   :  { %v199_v13 = vsel %vm197_vm2, %v198_v11, %v196_v12 }
 0x181   :  { %v200_v14 = vadd.f32 1e-06, %v199_v13 }
 0x183   :  { %428 = vrcp.f32 %v200_v14 }
 0x190   :  { %v429_v22 = vpop.eup %428 }
 0x191   :  { %v210_v26 = vrot.slane %v429_v22, %v124_v36  ;;  %v319_v36 = vrot.slane %v53_v25, %v225_v17 }
 0x193   :  { %v212_v31 = vmul.f32 %v210_v26, %v127_v40  ;;  %v213_v32 = vmul.f32 %v210_v26, %v128_v41 }
 0x195   :  { %v257_v42 = vcombine.high %v212_v31, %v212_v31  ;;  %v264_v43 = vrot.slane %v212_v31, %v554_v5  ;;  %v274_v44 = vcombine.high %v213_v32, %v213_v32  ;;  %v281_v3 = vrot.slane %v213_v32, %v554_v5 }
 0x197   :  { %v271_v48 = vrot.slane %v257_v42, %v554_v5  ;;  %v272_v40 = vcombine.high %v264_v43, %v264_v43  ;;  %v288_v41 = vrot.slane %v274_v44, %v554_v5  ;;  %v289_v49 = vcombine.high %v281_v3, %v281_v3 }
 0x198   :  { %v299_v50 = vmul.f32 %v264_v43, %v218_v27  ;;  %v303_v51 = vmul.f32 %v281_v3, %v234_v33 }
 0x199   :  { %v273_v54 = vcombine.high %v271_v48, %v271_v48  ;;  %v290_v55 = vcombine.high %v288_v41, %v288_v41  ;;  %v300_v56 = vmul.f32 %v272_v40, %v222_v28  ;;  %v301_v57 = vmul.f32 %v271_v48, %v226_v29 }
 0x19a   :  { %v304_v58 = vmul.f32 %v289_v49, %v238_v34  ;;  %v305_v59 = vmul.f32 %v288_v41, %v242_v35  ;;  %v348_v62 = vadd.f32 %v311_v38, %v299_v50  ;;  %v352_v1 = vadd.f32 %v327_v39, %v303_v51 }
 0x19b   :  { %v302_v60 = vmul.f32 %v273_v54, %v230_v30  ;;  %v306_v61 = vmul.f32 %v290_v55, %v246_v37  ;;  %v349_v63 = vadd.f32 %v315_v45, %v300_v56  ;;  %v350_v0 = vadd.f32 %v319_v36, %v301_v57 }
 0x19c   :  { %v353_v2 = vadd.f32 %v331_v46, %v304_v58  ;;  %v354_v6 = vadd.f32 %v335_v47, %v305_v59 }
 0x19d   :  { %v351_v4 = vadd.f32 %v323_v52, %v302_v60  ;;  %v355_v7 = vadd.f32 %v339_v53, %v306_v61  ;;  %v364_v8 = vcombine.low %v348_v62, %v349_v63 }
 0x19e   :  { %v381_v9 = vcombine.low %v352_v1, %v353_v2 }
 0x19f   :  { %v365_v10 = vcombine.low %v350_v0, %v351_v4  ;;  %v382_v11 = vcombine.low %v354_v6, %v355_v7  ;;  %v372_v12 = vrot.slane %v364_v8, %v554_v5 }
 0x1a0   :  { %v389_v14 = vrot.slane %v381_v9, %v554_v5 }
 0x1a1   :  { %v379_v13 = vrot.slane %v365_v10, %v554_v5  ;;  %v396_v15 = vrot.slane %v382_v11, %v554_v5 }
 0x1a3   :  { %v380_v16 = vcombine.low %v372_v12, %v379_v13  ;;  %v397_v17 = vcombine.low %v389_v14, %v396_v15 }
 0x1a5   :  { %400 = vst [vmem:[#allocation8] sm:$0xff] %v380_v16  ;;  %401 = vst [vmem:[#allocation8 + $0x8] sm:$0xff] %v397_v17 }
 0x1a6   :  { %501 = shalt.err (!%p498_p5)
}
 0x1a7   :  { %411 = dma.vmem_to_hbm [thread:$0]  %s409_s2, 256, %s603_s3, [#allocation4]  }
 0x1a8   :  { %514 = dma.done.wait [#allocation4], 256  }
 0x1a9   :  { %515 = vsyncadd [#allocation4], 4294967040 }
 0x1aa   :  { %415 = vsyncpa [#allocation3], 1 }
 0x1ab   :  { %416 = vsyncpa [#allocation6], 1 }
 0x1ac   :  { %417 = vsyncpa [#allocation4], 1 }

</bundles_post_ra>
